<compile_context>
chip_gen: v5e
topology: v5e:2x2
jax: 0.10.0
libtpu: 0.0.40
codegen_flags: <defaults>
</compile_context>

<pallas_src>
import jax
import jax.numpy as jnp
from jax.experimental import pallas as pl
from jax.experimental.pallas import tpu as pltpu

LANES = 128


def _round_up(x, m):
    return ((x + m - 1) // m) * m


def _pad2d(a, rows, cols):
    pr, pc = rows - a.shape[0], cols - a.shape[1]
    if pr == 0 and pc == 0:
        return a
    return jnp.pad(a, ((0, pr), (0, pc)))


def _vmem_limit_bytes():
    # ~3/4 of physical VMEM, capped at 96 MiB:
    #   v5e/v6e (128 MiB physical) -> 96 MiB, v7x (64 MiB physical) -> 48 MiB.
    try:
        cap = pltpu.get_tpu_info().vmem_capacity_bytes
    except Exception:
        cap = 64 * 2**20  # conservative (v7x-sized) fallback
    return int(min(96 * 2**20, (3 * cap) // 4))


def gcn_project_kernel(adj_ref, x_ref, w1t_ref, b1_ref, w2t_ref, p_ref, acc_ref):
    """acc += adj_blk @ x_blk;  on last K: p = relu(acc @ W1t + b1) @ W2t."""
    k = pl.program_id(1)

    @pl.when(k == 0)
    def _():
        acc_ref[...] = jnp.zeros_like(acc_ref)

    acc_ref[...] += jnp.dot(adj_ref[...], x_ref[...],
                            preferred_element_type=jnp.float32)

    @pl.when(k == pl.num_programs(1) - 1)
    def _():
        h = jnp.dot(acc_ref[...].astype(w1t_ref.dtype), w1t_ref[...],
                    preferred_element_type=jnp.float32) + b1_ref[...]
        h = jnp.maximum(h, 0.0)                       # fused bias + relu in f32
        p = jnp.dot(h.astype(w2t_ref.dtype), w2t_ref[...],
                    preferred_element_type=jnp.float32)
        p_ref[...] = p.astype(p_ref.dtype)


def gcn_aggregate_kernel(adj_ref, p_ref, b2_ref, out_ref, acc_ref):
    """acc += adj_blk @ p_blk;  on last K: out = acc + b2."""
    k = pl.program_id(1)

    @pl.when(k == 0)
    def _():
        acc_ref[...] = jnp.zeros_like(acc_ref)

    acc_ref[...] += jnp.dot(adj_ref[...], p_ref[...],
                            preferred_element_type=jnp.float32)

    @pl.when(k == pl.num_programs(1) - 1)
    def _():
        out_ref[...] = (acc_ref[...] + b2_ref[...]).astype(out_ref.dtype)


def gcn_forward(x, adj, w1, b1, w2, b2, *, tm_target=256, tk_target=512):
    """x: [N, D_in], adj: [N, N], w1: [H, D_in], b1: [H], w2: [D_out, H], b2: [D_out]."""
    n, d_in = x.shape
    hidden = w1.shape[0]
    d_out = w2.shape[0]

    # Feature dims padded to full 128-lane widths (lane-dense stores, full MXU cols).
    d_in_p = _round_up(d_in, LANES)
    hid_p = _round_up(hidden, LANES)
    d_out_p = _round_up(d_out, LANES)

    # Node-dim padding / tile selection (all multiples of 128).
    np0 = _round_up(n, LANES)
    if np0 <= 512:
        n_p = np0
        tm = min(256 if n_p % 256 == 0 else 128, n_p)
        tk = n_p                       # single K block
    else:
        n_p = _round_up(n, 512)
        tm = tm_target                 # 256: MXU M-dim, even row-block count for 2 TCs
        tk = tk_target                 # 512-wide adj DMA blocks

    # bf16 MXU operands (f32 accumulation in-kernel); biases stay f32.
    # TODO(synk): hoist/cache the adj pad+cast when the same graph is reused
    # across calls -- it is an extra full HBM pass over N^2 per invocation.
    adj_p = _pad2d(adj, n_p, n_p).astype(jnp.bfloat16)
    x_p = _pad2d(x, n_p, d_in_p).astype(jnp.bfloat16)
    w1t_p = _pad2d(w1.T, d_in_p, hid_p).astype(jnp.bfloat16)
    w2t_p = _pad2d(w2.T, hid_p, d_out_p).astype(jnp.bfloat16)
    b1_p = _pad2d(b1.reshape(1, -1), 1, hid_p).astype(jnp.float32)
    b2_p = _pad2d(b2.reshape(1, -1), 1, d_out_p).astype(jnp.float32)

    grid = (n_p // tm, n_p // tk)
    adj_spec = pl.BlockSpec((tm, tk), lambda i, k: (i, k))
    out_spec = pl.BlockSpec((tm, d_out_p), lambda i, k: (i, 0))
    # Grid-invariant operands (weights / biases): full-array blocks, constant index.
    invariant = lambda a: pl.BlockSpec(a.shape, lambda i, k: (0,) * a.ndim)

    cparams = pltpu.CompilerParams(
        dimension_semantics=("parallel", "arbitrary"),
        vmem_limit_bytes=_vmem_limit_bytes(),
    )

    # Call 1: p = relu((adj @ x) @ W1.T + b1) @ W2.T, (row, K)-tiled over nodes.
    cost1 = pl.CostEstimate(
        flops=2 * n_p * n_p * d_in_p
        + 2 * n_p * d_in_p * hid_p
        + 2 * n_p * hid_p * d_out_p,
        transcendentals=0,
        bytes_accessed=2 * n_p * n_p                      # adj (bf16), one pass
        + 2 * n_p * d_in_p * grid[0]                      # x re-streamed per row block
        + 2 * (d_in_p * hid_p + hid_p * d_out_p)          # weights
        + 2 * n_p * d_out_p,                              # p out (bf16)
    )
    p = pl.pallas_call(
        gcn_project_kernel,
        out_shape=jax.ShapeDtypeStruct((n_p, d_out_p), jnp.bfloat16),
        grid=grid,
        in_specs=[
            adj_spec,
            pl.BlockSpec((tk, d_in_p), lambda i, k: (k, 0)),
            invariant(w1t_p),
            invariant(b1_p),
            invariant(w2t_p),
        ],
        out_specs=out_spec,
        scratch_shapes=[pltpu.VMEM((tm, d_in_p), jnp.float32)],
        compiler_params=cparams,
        cost_estimate=cost1,
    )(adj_p, x_p, w1t_p, b1_p, w2t_p)

    # Call 2: out = adj @ p + b2 (second aggregation on the narrow output width).
    cost2 = pl.CostEstimate(
        flops=2 * n_p * n_p * d_out_p,
        transcendentals=0,
        bytes_accessed=2 * n_p * n_p
        + 2 * n_p * d_out_p * grid[0]
        + 4 * n_p * d_out_p,
    )
    out = pl.pallas_call(
        gcn_aggregate_kernel,
        out_shape=jax.ShapeDtypeStruct((n_p, d_out_p), jnp.float32),
        grid=grid,
        in_specs=[
            adj_spec,
            pl.BlockSpec((tk, d_out_p), lambda i, k: (k, 0)),
            invariant(b2_p),
        ],
        out_specs=out_spec,
        scratch_shapes=[pltpu.VMEM((tm, d_out_p), jnp.float32)],
        compiler_params=cparams,
        cost_estimate=cost2,
    )(adj_p, p, b2_p)

    return out[:n, :d_out]


if __name__ == "__main__":
    key = jax.random.PRNGKey(0)
    N, D_IN, HIDDEN, D_OUT = 8, 16, 32, 8

    k1, k2, k3, k4, k5, k6 = jax.random.split(key, 6)
    x = jax.random.normal(k1, (N, D_IN), dtype=jnp.float32)
    adj = jax.random.uniform(k2, (N, N), dtype=jnp.float32)

    # Deterministic "Linear" params
    w1 = jax.random.normal(k3, (HIDDEN, D_IN), dtype=jnp.float32) * 0.1
    b1 = jax.random.normal(k4, (HIDDEN,), dtype=jnp.float32) * 0.1
    w2 = jax.random.normal(k5, (D_OUT, HIDDEN), dtype=jnp.float32) * 0.1
    b2 = jax.random.normal(k6, (D_OUT,), dtype=jnp.float32) * 0.1

    out = gcn_forward(x, adj, w1, b1, w2, b2)
    jax.block_until_ready(out)

    # Pure-JAX f32 reference (kernel uses bf16 MXU operands -> loose tolerance).
    ref_h = jnp.maximum(adj @ x @ w1.T + b1, 0.0)
    ref = adj @ ref_h @ w2.T + b2
    assert out.shape == ref.shape, "shape mismatch vs reference"
    assert jnp.allclose(out, ref, atol=5e-2, rtol=5e-2), "mismatch vs reference"

    print("KERNEL_OK")
</pallas_src>

<mosaic_0001>
module attributes {stable_mosaic.version = 11 : i64} {
  func.func @gcn_project_kernel(%arg0: i32, %arg1: i32, %arg2: memref<128x128xbf16, #tpu.memory_space<vmem>>, %arg3: memref<128x128xbf16, #tpu.memory_space<vmem>>, %arg4: memref<128x128xbf16, #tpu.memory_space<vmem>>, %arg5: memref<1x128xf32, #tpu.memory_space<vmem>>, %arg6: memref<128x128xbf16, #tpu.memory_space<vmem>>, %arg7: memref<128x128xbf16, #tpu.memory_space<vmem>>, %arg8: memref<128x128xf32, #tpu.memory_space<vmem>>) attributes {dimension_semantics = [#tpu.dimension_semantics<parallel>, #tpu.dimension_semantics<arbitrary>], iteration_bounds = array<i64: 1, 1>, scalar_prefetch = 0 : i64, scratch_operands = 1 : i64, tpu.core_type = #tpu.core_type<tc>, window_params = [{transform_indices = @transform_0, window_bounds = array<i64: 128, 128>}, {transform_indices = @transform_1, window_bounds = array<i64: 128, 128>}, {pipeline_mode = #tpu.pipeline_mode<synchronous>, transform_indices = @transform_2, window_bounds = array<i64: 128, 128>}, {pipeline_mode = #tpu.pipeline_mode<synchronous>, transform_indices = @transform_3, window_bounds = array<i64: 1, 128>}, {pipeline_mode = #tpu.pipeline_mode<synchronous>, transform_indices = @transform_4, window_bounds = array<i64: 128, 128>}, {transform_indices = @transform_5, window_bounds = array<i64: 128, 128>}]} {
    %c0_i32 = arith.constant 0 : i32
    %0 = arith.cmpi eq, %arg1, %c0_i32 : i32
    %1 = arith.extui %0 : i1 to i32
    %c0_i32_0 = arith.constant 0 : i32
    %2 = arith.cmpi ne, %1, %c0_i32_0 : i32
    scf.if %2 {
      %cst_10 = arith.constant 0.000000e+00 : f32
      %12 = vector.broadcast %cst_10 : f32 to vector<128x128xf32>
      %c0_11 = arith.constant 0 : index
      %c0_12 = arith.constant 0 : index
      %13 = vector.load %arg8[%c0_11, %c0_12] : memref<128x128xf32, #tpu.memory_space<vmem>>, vector<128x128xf32>
      tpu.vector_store %arg8[%c0_11, %c0_12], %12 {strides = array<i32>} : memref<128x128xf32, #tpu.memory_space<vmem>>, vector<128x128xf32>,
    } else {
    }
    %c0 = arith.constant 0 : index
    %c0_1 = arith.constant 0 : index
    %3 = vector.load %arg8[%c0, %c0_1] : memref<128x128xf32, #tpu.memory_space<vmem>>, vector<128x128xf32>
    %c0_2 = arith.constant 0 : index
    %c0_3 = arith.constant 0 : index
    %4 = vector.load %arg2[%c0_2, %c0_3] : memref<128x128xbf16, #tpu.memory_space<vmem>>, vector<128x128xbf16>
    %c0_4 = arith.constant 0 : index
    %c0_5 = arith.constant 0 : index
    %5 = vector.load %arg3[%c0_4, %c0_5] : memref<128x128xbf16, #tpu.memory_space<vmem>>, vector<128x128xbf16>
    %cst = arith.constant dense<0.000000e+00> : vector<128x128xf32>
    %6 = tpu.matmul %4, %5, %cst {dimension_numbers = #tpu.dot_dimension_numbers<[1], [0], [0], [1], [0, 0, 1, 1], [], []>} : vector<128x128xbf16>, vector<128x128xbf16>, vector<128x128xf32> -> vector<128x128xf32>
    %7 = arith.addf %3, %6 : vector<128x128xf32>
    %c0_6 = arith.constant 0 : index
    %c0_7 = arith.constant 0 : index
    %8 = vector.load %arg8[%c0_6, %c0_7] : memref<128x128xf32, #tpu.memory_space<vmem>>, vector<128x128xf32>
    tpu.vector_store %arg8[%c0_6, %c0_7], %7 {strides = array<i32>} : memref<128x128xf32, #tpu.memory_space<vmem>>, vector<128x128xf32>,
    %c0_i32_8 = arith.constant 0 : i32
    %9 = arith.cmpi eq, %arg1, %c0_i32_8 : i32
    %10 = arith.extui %9 : i1 to i32
    %c0_i32_9 = arith.constant 0 : i32
    %11 = arith.cmpi ne, %10, %c0_i32_9 : i32
    scf.if %11 {
      %c0_10 = arith.constant 0 : index
      %c0_11 = arith.constant 0 : index
      %12 = vector.load %arg8[%c0_10, %c0_11] : memref<128x128xf32, #tpu.memory_space<vmem>>, vector<128x128xf32>
      %13 = arith.truncf %12 : vector<128x128xf32> to vector<128x128xbf16>
      %c0_12 = arith.constant 0 : index
      %c0_13 = arith.constant 0 : index
      %14 = vector.load %arg4[%c0_12, %c0_13] : memref<128x128xbf16, #tpu.memory_space<vmem>>, vector<128x128xbf16>
      %cst_14 = arith.constant dense<0.000000e+00> : vector<128x128xf32>
      %15 = tpu.matmul %13, %14, %cst_14 {dimension_numbers = #tpu.dot_dimension_numbers<[1], [0], [0], [1], [0, 0, 1, 1], [], []>} : vector<128x128xbf16>, vector<128x128xbf16>, vector<128x128xf32> -> vector<128x128xf32>
      %c0_15 = arith.constant 0 : index
      %c0_16 = arith.constant 0 : index
      %16 = vector.load %arg5[%c0_15, %c0_16] : memref<1x128xf32, #tpu.memory_space<vmem>>, vector<1x128xf32>
      %17 = vector.broadcast %16 : vector<1x128xf32> to vector<128x128xf32>
      %18 = arith.addf %15, %17 : vector<128x128xf32>
      %cst_17 = arith.constant 0.000000e+00 : f32
      %19 = vector.broadcast %cst_17 : f32 to vector<128x128xf32>
      %20 = arith.maximumf %18, %19 : vector<128x128xf32>
      %21 = arith.truncf %20 : vector<128x128xf32> to vector<128x128xbf16>
      %c0_18 = arith.constant 0 : index
      %c0_19 = arith.constant 0 : index
      %22 = vector.load %arg6[%c0_18, %c0_19] : memref<128x128xbf16, #tpu.memory_space<vmem>>, vector<128x128xbf16>
      %cst_20 = arith.constant dense<0.000000e+00> : vector<128x128xf32>
      %23 = tpu.matmul %21, %22, %cst_20 {dimension_numbers = #tpu.dot_dimension_numbers<[1], [0], [0], [1], [0, 0, 1, 1], [], []>} : vector<128x128xbf16>, vector<128x128xbf16>, vector<128x128xf32> -> vector<128x128xf32>
      %24 = arith.truncf %23 : vector<128x128xf32> to vector<128x128xbf16>
      %c0_21 = arith.constant 0 : index
      %c0_22 = arith.constant 0 : index
      %25 = vector.load %arg7[%c0_21, %c0_22] : memref<128x128xbf16, #tpu.memory_space<vmem>>, vector<128x128xbf16>
      tpu.vector_store %arg7[%c0_21, %c0_22], %24 {strides = array<i32>} : memref<128x128xbf16, #tpu.memory_space<vmem>>, vector<128x128xbf16>,
    } else {
    }
    return
  }
  func.func @transform_0(%arg0: i32, %arg1: i32) -> (i32, i32) {
    %c0_i32 = arith.constant 0 : i32
    return %arg0, %arg1 : i32, i32
  }
  func.func @transform_1(%arg0: i32, %arg1: i32) -> (i32, i32) {
    %c0_i32 = arith.constant 0 : i32
    %c0_i32_0 = arith.constant 0 : i32
    return %arg1, %c0_i32 : i32, i32
  }
  func.func @transform_2(%arg0: i32, %arg1: i32) -> (i32, i32) {
    %c0_i32 = arith.constant 0 : i32
    %c0_i32_0 = arith.constant 0 : i32
    %c0_i32_1 = arith.constant 0 : i32
    return %c0_i32, %c0_i32_0 : i32, i32
  }
  func.func @transform_3(%arg0: i32, %arg1: i32) -> (i32, i32) {
    %c0_i32 = arith.constant 0 : i32
    %c0_i32_0 = arith.constant 0 : i32
    %c0_i32_1 = arith.constant 0 : i32
    return %c0_i32, %c0_i32_0 : i32, i32
  }
  func.func @transform_4(%arg0: i32, %arg1: i32) -> (i32, i32) {
    %c0_i32 = arith.constant 0 : i32
    %c0_i32_0 = arith.constant 0 : i32
    %c0_i32_1 = arith.constant 0 : i32
    return %c0_i32, %c0_i32_0 : i32, i32
  }
  func.func @transform_5(%arg0: i32, %arg1: i32) -> (i32, i32) {
    %c0_i32 = arith.constant 0 : i32
    %c0_i32_0 = arith.constant 0 : i32
    return %arg0, %c0_i32 : i32, i32
  }
}

</mosaic_0001>

<bundles_post_ra>
// kernel: tpu_custom_call.1
= control target key start
LH: loop header
LB: loop body
LE: loop exit
PB: predicated region body
PF: predicated region fallthrough
CT: control target
= control target key end

     0   :  { %10 = vsyncpa [#allocation4], 0  ;;  %s1100_s0 = inlined_call_operand.hbm [shape: bf16[128,128], index: 0, kind: input, shape index: {}]   ;;  %s1101_s1 = inlined_call_operand.hbm [shape: bf16[128,128], index: 1, kind: input, shape index: {}]   ;;  %s1102_s2 = inlined_call_operand.hbm [shape: bf16[128,128], index: 2, kind: input, shape index: {}]   ;;  %s1103_s3 = inlined_call_operand.vmem [shape: f32[1,128], index: 3, kind: input, shape index: {}]   ;;  %s1104_s4 = inlined_call_operand.hbm [shape: bf16[128,128], index: 4, kind: input, shape index: {}]   ;;  %s1105_s5 = inlined_call_operand.hbm [shape: bf16[128,128], index: 5, kind: output, shape index: {}]  }
   0x1   :  { %11 = vsyncpa [#allocation7], 0 }
   0x2   :  { %12 = vsyncpa [#allocation10], 0 }
   0x3   :  { %13 = vsyncpa [#allocation5], 0  ;;  %s31_s20 = sshll.u32 %s1101_s1, 4  ;;  %s1030_s21 = smov [#allocation6]   ;;  %s32_s20 = int_to_ptr.hbm [resolvable:$true] %s31_s20 }
   0x4   :  { %s33_s22 = sshll.u32 %s1030_s21, 4  ;;  %s18_s25 = sshll.u32 %s1100_s0, 4  ;;  %s34_s22 = int_to_ptr.vmem [resolvable:$true] %s33_s22  ;;  %s19_s25 = int_to_ptr.hbm [resolvable:$true] %s18_s25 }
   0x5   :  { %s1031_s26 = smov 64   ;;  %s1032_s27 = smov 4  }
   0x6   :  { %39 = dma.hbm_to_vmem [thread:$0]  %s32_s20, 1024, %s34_s22, [#allocation7], %s1031_s26, %s1031_s26, %s1032_s27  }
   0x7   :  { %s1033_s28 = smov [#allocation3]   ;;  %s44_s1 = sshll.u32 %s1102_s2, 4  ;;  %s45_s1 = int_to_ptr.hbm [resolvable:$true] %s44_s1 }
   0x8   :  { %s20_s29 = sshll.u32 %s1033_s28, 4  ;;  %s59_s8 = sshll.u32 %s1104_s4, 4  ;;  %s21_s29 = int_to_ptr.vmem [resolvable:$true] %s20_s29  ;;  %s60_s8 = int_to_ptr.hbm [resolvable:$true] %s59_s8 }
   0x9   :  { %26 = dma.hbm_to_vmem [thread:$0]  %s19_s25, 1024, %s21_s29, [#allocation4], %s1031_s26, %s1031_s26, %s1032_s27  }
   0xa   :  { %s1034_s9 = smov [#allocation8]   ;;  %s1035_s11 = smov [#allocation9]  }
   0xb   :  { %s46_s10 = sshll.u32 %s1034_s9, 4  ;;  %s61_s2 = sshll.u32 %s1035_s11, 4  ;;  %s47_s10 = int_to_ptr.vmem [resolvable:$true] %s46_s10  ;;  %s62_s2 = int_to_ptr.vmem [resolvable:$true] %s61_s2 }
   0xc   :  { %52 = dma.hbm_to_vmem [thread:$0]  %s45_s1, 1024, %s47_s10, [#allocation7], %s1031_s26, %s1031_s26, %s1032_s27  }
   0xd   :  { %67 = dma.hbm_to_vmem [thread:$0]  %s60_s8, 1024, %s62_s2, [#allocation10], %s1031_s26, %s1031_s26, %s1032_s27  }
   0xe   :  { %1022 = dma.done.wait [#allocation4], 1024  }
   0xf   :  { %1023 = vsyncadd [#allocation4], 4294966272 }
  0x10   :  { %1024 = dma.done.wait [#allocation7], 2048  }
  0x11   :  { %1025 = vsyncadd [#allocation7], 4294965248 }
  0x12   :  { %1026 = dma.done.wait [#allocation10], 1024  }
  0x13   :  { %1027 = vsyncadd [#allocation10], 4294966272  ;;  %v806_v0 = vld [vmem:[#allocation6 + $0x38] sm:$0xff]  ;;  %v805_v1 = vld [vmem:[#allocation6 + $0x30] sm:$0xff]  ;;  %s648_s16 = sshll.u32 %s1105_s5, 4  ;;  %s649_s16 = int_to_ptr.hbm [resolvable:$true] %s648_s16 }
  0x14   :  { %248 = vmatpush.bf16.msra.mxu0 %v806_v0  ;;  %870 = vmatpush.bf16.msra.mxu3 %v806_v0  ;;  %v804_v2 = vld [vmem:[#allocation6 + $0x28] sm:$0xff]  ;;  %v803_v3 = vld [vmem:[#allocation6 + $0x20] sm:$0xff]  ;;  %v802_v4 = vld [vmem:[#allocation6 + $0x18] sm:$0xff] }
  0x15   :  { %v801_v5 = vld [vmem:[#allocation6 + $0x10] sm:$0xff]  ;;  %v800_v6 = vld [vmem:[#allocation6 + $0x8] sm:$0xff]  ;;  %v799_v7 = vld [vmem:[#allocation6] sm:$0xff] }
  0x16   :  { %v791_v8 = vld [vmem:[#allocation3] sm:$0xff]  ;;  %v797_v9 = vld [vmem:[#allocation3 + $0x30] sm:$0xff]  ;;  %v792_v10 = vld [vmem:[#allocation3 + $0x8] sm:$0xff] }
  0x17   :  { %v798_v11 = vld [vmem:[#allocation3 + $0x38] sm:$0xff]  ;;  %v793_v12 = vld [vmem:[#allocation3 + $0x10] sm:$0xff]  ;;  %v812_v16 = vld [vmem:[#allocation8 + $0x28] sm:$0xff] }
  0x18   :  { %249 = vmatpush.bf16.msra.mxu0 %v805_v1  ;;  %871 = vmatpush.bf16.msra.mxu3 %v805_v1  ;;  %v794_v13 = vld [vmem:[#allocation3 + $0x18] sm:$0xff]  ;;  %v813_v15 = vld [vmem:[#allocation8 + $0x30] sm:$0xff]  ;;  %v811_v17 = vld [vmem:[#allocation8 + $0x20] sm:$0xff] }
  0x19   :  { %v814_v14 = vld [vmem:[#allocation8 + $0x38] sm:$0xff]  ;;  %v795_v18 = vld [vmem:[#allocation3 + $0x20] sm:$0xff]  ;;  %v796_v20 = vld [vmem:[#allocation3 + $0x28] sm:$0xff] }
  0x1a   :  { %424 = vmatpush.bf16.msra.mxu1 %v814_v14  ;;  %v810_v19 = vld [vmem:[#allocation8 + $0x18] sm:$0xff]  ;;  %v809_v21 = vld [vmem:[#allocation8 + $0x10] sm:$0xff]  ;;  %v808_v22 = vld [vmem:[#allocation8 + $0x8] sm:$0xff] }
  0x1b   :  { %v807_v23 = vld [vmem:[#allocation8] sm:$0xff]  ;;  %v822_v42 = vld [vmem:[#allocation9 + $0x38] sm:$0xff]  ;;  %v821_v43 = vld [vmem:[#allocation9 + $0x30] sm:$0xff] }
  0x1c   :  { %250 = vmatpush.bf16.msra.mxu0 %v804_v2  ;;  %872 = vmatpush.bf16.msra.mxu3 %v804_v2  ;;  %v820_v45 = vld [vmem:[#allocation9 + $0x28] sm:$0xff]  ;;  %v819_v46 = vld [vmem:[#allocation9 + $0x20] sm:$0xff]  ;;  %v818_v52 = vld [vmem:[#allocation9 + $0x18] sm:$0xff] }
  0x1d   :  { %561 = vmatpush.bf16.msra.mxu2 %v822_v42  ;;  %v817_v53 = vld [vmem:[#allocation9 + $0x10] sm:$0xff]  ;;  %v816_v54 = vld [vmem:[#allocation9 + $0x8] sm:$0xff]  ;;  %v815_v55 = vld [vmem:[#allocation9] sm:$0xff] }
  0x1e   :  { %425 = vmatpush.bf16.msra.mxu1 %v813_v15  ;;  %v901_v57 = vld [vmem:[%s1103_s3] ss:$0 sm:$0xff]  ;;  %s1036_s3 = smov [#allocation11]  }
  0x1f   :  { %s646_s13 = sshll.u32 %s1036_s3, 4  ;;  %s647_s13 = int_to_ptr.vmem [resolvable:$true] %s646_s13 }
  0x20   :  { %251 = vmatpush.bf16.msra.mxu0 %v803_v3  ;;  %873 = vmatpush.bf16.msra.mxu3 %v803_v3 }
  0x21   :  { %562 = vmatpush.bf16.msra.mxu2 %v821_v43 }
  0x22   :  { %426 = vmatpush.bf16.msra.mxu1 %v812_v16 }
  0x24   :  { %252 = vmatpush.bf16.msra.mxu0 %v802_v4  ;;  %874 = vmatpush.bf16.msra.mxu3 %v802_v4 }
  0x25   :  { %563 = vmatpush.bf16.msra.mxu2 %v820_v45 }
  0x26   :  { %427 = vmatpush.bf16.msra.mxu1 %v811_v17 }
  0x28   :  { %253 = vmatpush.bf16.msra.mxu0 %v801_v5  ;;  %875 = vmatpush.bf16.msra.mxu3 %v801_v5 }
  0x29   :  { %564 = vmatpush.bf16.msra.mxu2 %v819_v46 }
  0x2a   :  { %428 = vmatpush.bf16.msra.mxu1 %v810_v19 }
  0x2c   :  { %254 = vmatpush.bf16.msra.mxu0 %v800_v6  ;;  %876 = vmatpush.bf16.msra.mxu3 %v800_v6 }
  0x2d   :  { %565 = vmatpush.bf16.msra.mxu2 %v818_v52 }
  0x2e   :  { %429 = vmatpush.bf16.msra.mxu1 %v809_v21 }
  0x30   :  { %255 = vmatpush.bf16.msra.mxu0 %v799_v7  ;;  %877 = vmatpush.bf16.msra.mxu3 %v799_v7 }
  0x31   :  { %566 = vmatpush.bf16.msra.mxu2 %v817_v53 }
  0x32   :  { %430 = vmatpush.bf16.msra.mxu1 %v808_v22 }
  0x33   :  { %256 = vmatmul.bf16.vlgmr.msra.gmra.mxu0 %v791_v8  ;;  %286 = vmatmul.bf16.vlgmr.msra.gmra.mxu3 %v797_v9 }
  0x34   :  { %878 = vmatpush.bf16.msrb.mxu3 %v814_v14 }
  0x35   :  { %567 = vmatpush.bf16.msra.mxu2 %v816_v54 }
  0x36   :  { %431 = vmatpush.bf16.msra.mxu1 %v807_v23 }
  0x38   :  { %879 = vmatpush.bf16.msrb.mxu3 %v813_v15 }
  0x39   :  { %568 = vmatpush.bf16.msra.mxu2 %v815_v55 }
  0x3c   :  { %880 = vmatpush.bf16.msrb.mxu3 %v812_v16 }
  0x40   :  { %881 = vmatpush.bf16.msrb.mxu3 %v811_v17 }
  0x43   :  { %261 = vmatmul.bf16.gmra.mxu0 %v792_v10  ;;  %291 = vmatmul.bf16.gmra.mxu3 %v798_v11 }
  0x44   :  { %882 = vmatpush.bf16.msrb.mxu3 %v810_v19 }
  0x48   :  { %883 = vmatpush.bf16.msrb.mxu3 %v809_v21 }
  0x4c   :  { %884 = vmatpush.bf16.msrb.mxu3 %v808_v22 }
  0x50   :  { %885 = vmatpush.bf16.msrb.mxu3 %v807_v23 }
  0x53   :  { %266 = vmatmul.bf16.gmra.mxu0 %v793_v12 }
  0x54   :  { %886 = vmatpush.bf16.msra.mxu3 %v822_v42 }
  0x58   :  { %887 = vmatpush.bf16.msra.mxu3 %v821_v43 }
  0x5c   :  { %888 = vmatpush.bf16.msra.mxu3 %v820_v45 }
  0x60   :  { %889 = vmatpush.bf16.msra.mxu3 %v819_v46 }
  0x63   :  { %271 = vmatmul.bf16.gmra.mxu0 %v794_v13 }
  0x64   :  { %890 = vmatpush.bf16.msra.mxu3 %v818_v52 }
  0x68   :  { %891 = vmatpush.bf16.msra.mxu3 %v817_v53 }
  0x6c   :  { %892 = vmatpush.bf16.msra.mxu3 %v816_v54 }
  0x70   :  { %893 = vmatpush.bf16.msra.mxu3 %v815_v55 }
  0x73   :  { %276 = vmatmul.bf16.gmra.mxu0 %v795_v18 }
  0x83   :  { %281 = vmatmul.bf16.gmra.mxu0 %v796_v20 }
  0xb0   :  { %v257_v24 = vpop.f32.mrf.mxu0 }
  0xb6   :  { %v287_v25 = vpop.f32.mrf.mxu3 }
  0xb8   :  { %v259_v26 = vpop.f32.mrf.mxu0 }
  0xb9   :  { %v348_v27 = vpack.c.bf16 %v259_v26, %v257_v24 }
  0xbb   :  { %432 = vmatmul.bf16.vlgmr.msra.gmra.mxu1 %v348_v27 }
  0xbe   :  { %v289_v28 = vpop.f32.mrf.mxu3 }
  0xbf   :  { %v354_v29 = vpack.c.bf16 %v289_v28, %v287_v25 }
  0xc0   :  { %v262_v30 = vpop.f32.mrf.mxu0 }
  0xc1   :  { %462 = vmatmul.bf16.vlgmr.msrb.gmra.mxu3 %v354_v29 }
  0xc6   :  { %v292_v31 = vpop.f32.mrf.mxu3 }
  0xc8   :  { %v264_v32 = vpop.f32.mrf.mxu0 }
  0xc9   :  { %v349_v33 = vpack.c.bf16 %v264_v32, %v262_v30 }
  0xcb   :  { %437 = vmatmul.bf16.gmra.mxu1 %v349_v33 }
  0xce   :  { %v294_v34 = vpop.f32.mrf.mxu3 }
  0xcf   :  { %v355_v35 = vpack.c.bf16 %v294_v34, %v292_v31 }
  0xd0   :  { %v267_v36 = vpop.f32.mrf.mxu0 }
  0xd1   :  { %467 = vmatmul.bf16.gmra.mxu3 %v355_v35 }
  0xd8   :  { %v269_v37 = vpop.f32.mrf.mxu0 }
  0xd9   :  { %v350_v38 = vpack.c.bf16 %v269_v37, %v267_v36 }
  0xdb   :  { %442 = vmatmul.bf16.gmra.mxu1 %v350_v38 }
  0xe0   :  { %v272_v39 = vpop.f32.mrf.mxu0 }
  0xe8   :  { %v274_v40 = vpop.f32.mrf.mxu0 }
  0xe9   :  { %v351_v41 = vpack.c.bf16 %v274_v40, %v272_v39 }
  0xeb   :  { %447 = vmatmul.bf16.gmra.mxu1 %v351_v41 }
  0xf0   :  { %v277_v44 = vpop.f32.mrf.mxu0 }
  0xf8   :  { %v279_v47 = vpop.f32.mrf.mxu0 }
  0xf9   :  { %v352_v48 = vpack.c.bf16 %v279_v47, %v277_v44 }
  0xfb   :  { %452 = vmatmul.bf16.gmra.mxu1 %v352_v48 }
 0x100   :  { %v282_v49 = vpop.f32.mrf.mxu0 }
 0x108   :  { %v284_v50 = vpop.f32.mrf.mxu0 }
 0x109   :  { %v353_v51 = vpack.c.bf16 %v284_v50, %v282_v49 }
 0x10b   :  { %457 = vmatmul.bf16.gmra.mxu1 %v353_v51 }
 0x138   :  { %v433_v56 = vpop.f32.mrf.mxu1 }
 0x139   :  { %v434_v58 = vadd.f32 %v901_v57, %v433_v56 }
 0x13b   :  { %v473_v61 = vmax.f32 %v434_v58, 0.0 }
 0x140   :  { %v435_v59 = vpop.f32.mrf.mxu1 }
 0x141   :  { %v436_v60 = vadd.f32 %v901_v57, %v435_v59 }
 0x143   :  { %v474_v62 = vmax.f32 %v436_v60, 0.0 }
 0x144   :  { %v463_v63 = vpop.f32.mrf.mxu3 }
 0x145   :  { %v489_v0 = vpack.c.bf16 %v474_v62, %v473_v61  ;;  %v464_v2 = vadd.f32 %v901_v57, %v463_v63 }
 0x147   :  { %569 = vmatmul.bf16.vlgmr.msra.gmra.mxu2 %v489_v0  ;;  %v485_v4 = vmax.f32 %v464_v2, 0.0 }
 0x148   :  { %v438_v1 = vpop.f32.mrf.mxu1 }
 0x149   :  { %v439_v6 = vadd.f32 %v901_v57, %v438_v1 }
 0x14b   :  { %v475_v11 = vmax.f32 %v439_v6, 0.0 }
 0x14c   :  { %v465_v3 = vpop.f32.mrf.mxu3 }
 0x14d   :  { %v466_v5 = vadd.f32 %v901_v57, %v465_v3 }
 0x14f   :  { %v486_v7 = vmax.f32 %v466_v5, 0.0 }
 0x150   :  { %v440_v8 = vpop.f32.mrf.mxu1 }
 0x151   :  { %v441_v9 = vadd.f32 %v901_v57, %v440_v8  ;;  %v495_v10 = vpack.c.bf16 %v486_v7, %v485_v4 }
 0x153   :  { %v476_v12 = vmax.f32 %v441_v9, 0.0  ;;  %599 = vmatmul.bf16.vlgmr.msra.gmra.mxu3 %v495_v10 }
 0x154   :  { %v468_v13 = vpop.f32.mrf.mxu3 }
 0x155   :  { %v490_v14 = vpack.c.bf16 %v476_v12, %v475_v11  ;;  %v469_v16 = vadd.f32 %v901_v57, %v468_v13 }
 0x157   :  { %574 = vmatmul.bf16.gmra.mxu2 %v490_v14  ;;  %v487_v18 = vmax.f32 %v469_v16, 0.0 }
 0x158   :  { %v443_v15 = vpop.f32.mrf.mxu1 }
 0x159   :  { %v444_v20 = vadd.f32 %v901_v57, %v443_v15 }
 0x15b   :  { %v477_v25 = vmax.f32 %v444_v20, 0.0 }
 0x15c   :  { %v470_v17 = vpop.f32.mrf.mxu3 }
 0x15d   :  { %v471_v19 = vadd.f32 %v901_v57, %v470_v17 }
 0x15f   :  { %v488_v21 = vmax.f32 %v471_v19, 0.0 }
 0x160   :  { %v445_v22 = vpop.f32.mrf.mxu1 }
 0x161   :  { %v446_v23 = vadd.f32 %v901_v57, %v445_v22  ;;  %v496_v24 = vpack.c.bf16 %v488_v21, %v487_v18 }
 0x163   :  { %v478_v26 = vmax.f32 %v446_v23, 0.0  ;;  %604 = vmatmul.bf16.gmra.mxu3 %v496_v24 }
 0x165   :  { %v491_v27 = vpack.c.bf16 %v478_v26, %v477_v25 }
 0x167   :  { %579 = vmatmul.bf16.gmra.mxu2 %v491_v27 }
 0x168   :  { %v448_v28 = vpop.f32.mrf.mxu1 }
 0x169   :  { %v449_v29 = vadd.f32 %v901_v57, %v448_v28 }
 0x16b   :  { %v479_v32 = vmax.f32 %v449_v29, 0.0 }
 0x170   :  { %v450_v30 = vpop.f32.mrf.mxu1 }
 0x171   :  { %v451_v31 = vadd.f32 %v901_v57, %v450_v30 }
 0x173   :  { %v480_v33 = vmax.f32 %v451_v31, 0.0 }
 0x175   :  { %v492_v34 = vpack.c.bf16 %v480_v33, %v479_v32 }
 0x177   :  { %584 = vmatmul.bf16.gmra.mxu2 %v492_v34 }
 0x178   :  { %v453_v35 = vpop.f32.mrf.mxu1 }
 0x179   :  { %v454_v36 = vadd.f32 %v901_v57, %v453_v35 }
 0x17b   :  { %v481_v39 = vmax.f32 %v454_v36, 0.0 }
 0x180   :  { %v455_v37 = vpop.f32.mrf.mxu1 }
 0x181   :  { %v456_v38 = vadd.f32 %v901_v57, %v455_v37 }
 0x183   :  { %v482_v40 = vmax.f32 %v456_v38, 0.0 }
 0x185   :  { %v493_v41 = vpack.c.bf16 %v482_v40, %v481_v39 }
 0x187   :  { %589 = vmatmul.bf16.gmra.mxu2 %v493_v41 }
 0x188   :  { %v458_v42 = vpop.f32.mrf.mxu1 }
 0x189   :  { %v459_v43 = vadd.f32 %v901_v57, %v458_v42 }
 0x18b   :  { %v483_v46 = vmax.f32 %v459_v43, 0.0 }
 0x190   :  { %v460_v44 = vpop.f32.mrf.mxu1 }
 0x191   :  { %v461_v45 = vadd.f32 %v901_v57, %v460_v44 }
 0x193   :  { %v484_v47 = vmax.f32 %v461_v45, 0.0 }
 0x195   :  { %v494_v48 = vpack.c.bf16 %v484_v47, %v483_v46 }
 0x197   :  { %594 = vmatmul.bf16.gmra.mxu2 %v494_v48 }
 0x1ca   :  { %v570_v49 = vpop.f32.mrf.mxu2 }
 0x1d2   :  { %v572_v50 = vpop.f32.mrf.mxu2 }
 0x1d3   :  { %v826_v51 = vpack.c.bf16 %v572_v50, %v570_v49 }
 0x1d5   :  { %827 = vst [vmem:[#allocation11] sm:$0xff] %v826_v51  }
 0x1d6   :  { %v600_v52 = vpop.f32.mrf.mxu3 }
 0x1da   :  { %v575_v53 = vpop.f32.mrf.mxu2 }
 0x1de   :  { %v602_v54 = vpop.f32.mrf.mxu3 }
 0x1df   :  { %v856_v55 = vpack.c.bf16 %v602_v54, %v600_v52 }
 0x1e1   :  { %868 = vst [vmem:[#allocation11 + $0x30] sm:$0xff] %v856_v55  }
 0x1e2   :  { %v577_v56 = vpop.f32.mrf.mxu2 }
 0x1e3   :  { %v831_v58 = vpack.c.bf16 %v577_v56, %v575_v53 }
 0x1e5   :  { %863 = vst [vmem:[#allocation11 + $0x8] sm:$0xff] %v831_v58  }
 0x1e6   :  { %v605_v59 = vpop.f32.mrf.mxu3 }
 0x1ea   :  { %v580_v60 = vpop.f32.mrf.mxu2 }
 0x1ee   :  { %v607_v61 = vpop.f32.mrf.mxu3 }
 0x1ef   :  { %v861_v57 = vpack.c.bf16 %v607_v61, %v605_v59 }
 0x1f1   :  { %869 = vst [vmem:[#allocation11 + $0x38] sm:$0xff] %v861_v57  }
 0x1f2   :  { %v582_v62 = vpop.f32.mrf.mxu2 }
 0x1f3   :  { %v836_v63 = vpack.c.bf16 %v582_v62, %v580_v60 }
 0x1f5   :  { %864 = vst [vmem:[#allocation11 + $0x10] sm:$0xff] %v836_v63  }
 0x1fa   :  { %v585_v0 = vpop.f32.mrf.mxu2 }
 0x202   :  { %v587_v1 = vpop.f32.mrf.mxu2 }
 0x203   :  { %v841_v2 = vpack.c.bf16 %v587_v1, %v585_v0 }
 0x205   :  { %865 = vst [vmem:[#allocation11 + $0x18] sm:$0xff] %v841_v2  }
 0x20a   :  { %v590_v3 = vpop.f32.mrf.mxu2 }
 0x212   :  { %v592_v4 = vpop.f32.mrf.mxu2 }
 0x213   :  { %v846_v5 = vpack.c.bf16 %v592_v4, %v590_v3 }
 0x215   :  { %866 = vst [vmem:[#allocation11 + $0x20] sm:$0xff] %v846_v5  }
 0x21a   :  { %v595_v6 = vpop.f32.mrf.mxu2 }
 0x222   :  { %v597_v7 = vpop.f32.mrf.mxu2 }
 0x223   :  { %v851_v8 = vpack.c.bf16 %v597_v7, %v595_v6 }
 0x225   :  { %867 = vst [vmem:[#allocation11 + $0x28] sm:$0xff] %v851_v8  }
 0x226   :  { %654 = dma.vmem_to_hbm [thread:$0]  %s647_s13, 1024, %s649_s16, [#allocation5], %s1031_s26, %s1031_s26, %s1032_s27  }
 0x227   :  { %1028 = dma.done.wait [#allocation5], 1024  }
 0x228   :  { %1029 = vsyncadd [#allocation5], 4294966272 }
 0x229   :  { %659 = vsyncpa [#allocation4], 1 }
 0x22a   :  { %660 = vsyncpa [#allocation7], 1 }
 0x22b   :  { %661 = vsyncpa [#allocation10], 1 }
 0x22c   :  { %662 = vsyncpa [#allocation5], 1 }

</bundles_post_ra>
